<compile_context>
chip_gen: v5e
topology: v5e:2x2
jax: 0.10.0
libtpu: 0.0.40
codegen_flags: <defaults>
</compile_context>

<pallas_src>
import functools

import jax
import jax.numpy as jnp
from jax.experimental import pallas as pl
from jax.experimental.pallas import tpu as pltpu


def _round_up(x, m):
    return (x + m - 1) // m * m


# ---------------------------------------------------------------------------
# Kernel
# ---------------------------------------------------------------------------
def ffn_kernel(x_ref, w1_ref, b1_ref, w2_ref, b2_ref, o_ref, acc_ref, *, num_k):
    """One (row-tile i, d_ff-chunk k) grid step of y = relu(x@W1+b1)@W2 + b2.

    acc[i] += relu(x[i] @ W1[:, k] + b1[k]) @ W2[k, :] ;  y[i] = acc[i] + b2
    x is cast to the weights' compute dtype in-kernel (VPU work hidden under
    the MXU); both matmuls accumulate in f32; the final d_ff chunk is fused
    straight into the output store.
    """
    x = x_ref[...].astype(w1_ref.dtype)

    # fc1 chunk: bf16 MXU matmul with f32 accumulation, bias + ReLU in f32.
    h = jnp.dot(x, w1_ref[...], preferred_element_type=jnp.float32)
    h = jnp.maximum(h + b1_ref[...], 0.0)

    # fc2 chunk contribution (f32).
    contrib = jnp.dot(h.astype(w2_ref.dtype), w2_ref[...],
                      preferred_element_type=jnp.float32)

    if num_k == 1:
        # Single d_ff chunk: no accumulator traffic at all.
        o_ref[...] = (contrib + b2_ref[...]).astype(o_ref.dtype)
    else:
        kf = pl.program_id(1)

        @pl.when(kf == 0)
        def _first():
            acc_ref[...] = contrib

        @pl.when(jnp.logical_and(kf > 0, kf < num_k - 1))
        def _middle():
            acc_ref[...] += contrib

        @pl.when(kf == num_k - 1)
        def _last():
            # Fused finalize: fold the last chunk + b2 into the output store.
            o_ref[...] = (acc_ref[...] + contrib + b2_ref[...]).astype(o_ref.dtype)


# ---------------------------------------------------------------------------
# Parameter preparation (hoisted out of the per-call path)
# ---------------------------------------------------------------------------
def prepare_ffn_params(w1, b1, w2, b2, *, compute_dtype=jnp.bfloat16):
    """Pad feature dims to multiples of 128 and cast weights to the MXU compute
    dtype ONCE at init time. w1: [d_model, d_ff], w2: [d_ff, d_model]."""
    d_model, d_ff = w1.shape
    assert w2.shape == (d_ff, d_model)
    d_model_p = _round_up(d_model, 128)
    d_ff_p = _round_up(d_ff, 128)
    w1_p = jnp.pad(w1, ((0, d_model_p - d_model),
                        (0, d_ff_p - d_ff))).astype(compute_dtype)
    w2_p = jnp.pad(w2, ((0, d_ff_p - d_ff),
                        (0, d_model_p - d_model))).astype(compute_dtype)
    b1_p = jnp.pad(jnp.reshape(b1, (1, d_ff)),
                   ((0, 0), (0, d_ff_p - d_ff))).astype(jnp.float32)
    b2_p = jnp.pad(jnp.reshape(b2, (1, d_model)),
                   ((0, 0), (0, d_model_p - d_model))).astype(jnp.float32)
    return w1_p, b1_p, w2_p, b2_p


def _vmem_capacity_bytes(default=64 * 1024 * 1024):
    try:
        cap = getattr(pltpu.get_tpu_info(), "vmem_capacity_bytes", None)
        if cap:
            return int(cap)
    except Exception:
        pass
    return default


# ---------------------------------------------------------------------------
# Forward wrapper
# ---------------------------------------------------------------------------
def position_wise_feed_forward(x, ffn_params, *, tm=None, tf=None,
                               out_dtype=None, vmem_limit_bytes=None):
    """x: [B, S, d_model]; ffn_params from prepare_ffn_params().
    Returns [B, S, d_model] in out_dtype (default: x.dtype)."""
    w1_p, b1_p, w2_p, b2_p = ffn_params
    B, S, d_model = x.shape
    d_model_p, d_ff_p = w1_p.shape
    assert d_model <= d_model_p and w2_p.shape == (d_ff_p, d_model_p)
    M = B * S
    out_dtype = x.dtype if out_dtype is None else out_dtype

    # ---- generation-aware defaults (v5e/v6e: 128 MiB VMEM, v7x: 64 MiB) -----
    cap = _vmem_capacity_bytes()
    if vmem_limit_bytes is None:
        vmem_limit_bytes = min((cap * 3) // 4, 100 * 1024 * 1024)
    big_vmem = cap >= 96 * 1024 * 1024
    if tm is None:
        tm = 1024 if big_vmem else 512
    if tf is None:
        tf = 1024 if big_vmem else 512

    ROW_ALIGN = 16  # sublane alignment safe for both f32 and bf16 row tiles

    def row_tiles(tm_target):
        # Balanced row tiling: minimizes padded-row MXU waste.
        n = max(1, -(-M // max(tm_target, ROW_ALIGN)))
        tm_e = _round_up(-(-M // n), ROW_ALIGN)
        return tm_e, tm_e * n

    def pick_tf(tf_target):
        tf_e = max(128, min(_round_up(tf_target, 128), d_ff_p))
        while d_ff_p % tf_e:
            tf_e -= 128
        return tf_e

    x_isz = jnp.dtype(x.dtype).itemsize
    w_isz = jnp.dtype(w1_p.dtype).itemsize
    o_isz = jnp.dtype(out_dtype).itemsize

    def footprint(tm_e, tf_e):
        return (2 * tm_e * d_model_p * x_isz        # x tile (double-buffered)
                + 2 * d_model_p * tf_e * w_isz      # W1 chunk
                + 2 * tf_e * d_model_p * w_isz      # W2 chunk
                + 2 * (tf_e + d_model_p) * 4        # bias chunks
                + 2 * tm_e * d_model_p * o_isz      # out tile
                + tm_e * d_model_p * 4              # f32 accumulator
                + 2 * tm_e * tf_e * 4)              # h intermediate + slack

    tm_eff, M_p = row_tiles(tm)
    tf_eff = pick_tf(tf)
    budget = max(vmem_limit_bytes - 4 * 1024 * 1024, 8 * 1024 * 1024)
    for _ in range(16):  # bounded auto-shrink (mainly for v7x's 64 MiB VMEM)
        if footprint(tm_eff, tf_eff) <= budget:
            break
        if tm_eff >= tf_eff and tm_eff > ROW_ALIGN:
            tm_eff, M_p = row_tiles(max(ROW_ALIGN, tm_eff // 2))
        elif tf_eff > 128:
            tf_eff = pick_tf(tf_eff // 2)
        else:
            break

    num_k = d_ff_p // tf_eff
    grid = (M_p // tm_eff, num_k)

    # Pad only the activation (weights were padded/cast once at init).
    x2 = jnp.pad(x.reshape(M, d_model),
                 ((0, M_p - M), (0, d_model_p - d_model)))

    acc_shape = (tm_eff, d_model_p) if num_k > 1 else (8, 128)

    cost = pl.CostEstimate(
        flops=4 * M_p * d_model_p * d_ff_p,
        transcendentals=0,
        bytes_accessed=int(M_p * d_model_p * (x_isz + o_isz)
                           + grid[0] * 2 * d_model_p * d_ff_p * w_isz),
    )

    out = pl.pallas_call(
        functools.partial(ffn_kernel, num_k=num_k),
        out_shape=jax.ShapeDtypeStruct((M_p, d_model_p), out_dtype),
        grid_spec=pltpu.PrefetchScalarGridSpec(
            num_scalar_prefetch=0,
            grid=grid,
            in_specs=[
                # x row tile (same block across the d_ff axis -> no re-DMA)
                pl.BlockSpec((tm_eff, d_model_p), lambda i, k: (i, 0)),
                # W1 column chunk
                pl.BlockSpec((d_model_p, tf_eff), lambda i, k: (0, k)),
                # b1 chunk (f32)
                pl.BlockSpec((1, tf_eff), lambda i, k: (0, k)),
                # W2 row chunk
                pl.BlockSpec((tf_eff, d_model_p), lambda i, k: (k, 0)),
                # b2 (applied once on the last chunk, f32)
                pl.BlockSpec((1, d_model_p), lambda i, k: (0, 0)),
            ],
            out_specs=pl.BlockSpec((tm_eff, d_model_p), lambda i, k: (i, 0)),
            scratch_shapes=[pltpu.VMEM(acc_shape, jnp.float32)],
        ),
        compiler_params=pltpu.CompilerParams(
            dimension_semantics=("parallel", "arbitrary"),
            vmem_limit_bytes=int(vmem_limit_bytes),
        ),
        cost_estimate=cost,
    )(x2, w1_p, b1_p, w2_p, b2_p)

    return out[:M, :d_model].reshape(B, S, d_model)


def init_params(key, d_model, d_ff, dtype=jnp.float32):
    """Deterministic init mimicking nn.Linear's uniform(-1/sqrt(fan_in), +)."""
    k1, k2, k3, k4 = jax.random.split(key, 4)
    lim1 = 1.0 / (d_model ** 0.5)
    lim2 = 1.0 / (d_ff ** 0.5)
    w1 = jax.random.uniform(k1, (d_model, d_ff), dtype, -lim1, lim1)
    b1 = jax.random.uniform(k2, (1, d_ff), dtype, -lim1, lim1)
    w2 = jax.random.uniform(k3, (d_ff, d_model), dtype, -lim2, lim2)
    b2 = jax.random.uniform(k4, (1, d_model), dtype, -lim2, lim2)
    return w1, b1, w2, b2


if __name__ == "__main__":
    key = jax.random.PRNGKey(0)

    def bf16_reference(x, w1, b1, w2, b2):
        # Same precision recipe as the kernel (bf16 MXU ops, f32 accumulation).
        xb = x.reshape(-1, x.shape[-1]).astype(jnp.bfloat16)
        h = jnp.maximum(
            jnp.dot(xb, w1.astype(jnp.bfloat16),
                    preferred_element_type=jnp.float32) + b1, 0.0)
        y = jnp.dot(h.astype(jnp.bfloat16), w2.astype(jnp.bfloat16),
                    preferred_element_type=jnp.float32) + b2
        return y.reshape(x.shape).astype(x.dtype)

    # Case 1: small shapes, single d_ff chunk (default tiles).
    kx, kp, key = jax.random.split(key, 3)
    batch, seq, d_model, d_ff = 2, 8, 32, 64
    x = jax.random.normal(kx, (batch, seq, d_model), dtype=jnp.float32)
    w1, b1, w2, b2 = init_params(kp, d_model, d_ff)
    params = prepare_ffn_params(w1, b1, w2, b2)
    y = jax.block_until_ready(position_wise_feed_forward(x, params))
    ref = bf16_reference(x, w1, b1, w2, b2)
    assert y.shape == (batch, seq, d_model)
    assert jnp.allclose(y, ref, atol=2e-2, rtol=2e-2), \
        float(jnp.max(jnp.abs(y - ref)))

    # Case 2: unaligned dims; forces multiple row tiles and multiple d_ff
    # chunks (exercises the accumulator + fused-finalize path).
    kx, kp, key = jax.random.split(key, 3)
    batch, seq, d_model, d_ff = 2, 24, 48, 200
    x = jax.random.normal(kx, (batch, seq, d_model), dtype=jnp.float32)
    w1, b1, w2, b2 = init_params(kp, d_model, d_ff)
    params = prepare_ffn_params(w1, b1, w2, b2)
    y = jax.block_until_ready(
        position_wise_feed_forward(x, params, tm=16, tf=128))
    ref = bf16_reference(x, w1, b1, w2, b2)
    assert y.shape == (batch, seq, d_model)
    assert jnp.allclose(y, ref, atol=2e-2, rtol=2e-2), \
        float(jnp.max(jnp.abs(y - ref)))

    print("KERNEL_OK")
</pallas_src>

<mosaic_0001>
module attributes {stable_mosaic.version = 11 : i64} {
  func.func @ffn_kernel(%arg0: i32, %arg1: i32, %arg2: memref<16x128xf32, #tpu.memory_space<vmem>>, %arg3: memref<128x128xbf16, #tpu.memory_space<vmem>>, %arg4: memref<1x128xf32, #tpu.memory_space<vmem>>, %arg5: memref<128x128xbf16, #tpu.memory_space<vmem>>, %arg6: memref<1x128xf32, #tpu.memory_space<vmem>>, %arg7: memref<16x128xf32, #tpu.memory_space<vmem>>, %arg8: memref<8x128xf32, #tpu.memory_space<vmem>>) attributes {dimension_semantics = [#tpu.dimension_semantics<parallel>, #tpu.dimension_semantics<arbitrary>], iteration_bounds = array<i64: 1, 1>, scalar_prefetch = 0 : i64, scratch_operands = 1 : i64, tpu.core_type = #tpu.core_type<tc>, window_params = [{transform_indices = @transform_0, window_bounds = array<i64: 16, 128>}, {transform_indices = @transform_1, window_bounds = array<i64: 128, 128>}, {transform_indices = @transform_2, window_bounds = array<i64: 1, 128>}, {transform_indices = @transform_3, window_bounds = array<i64: 128, 128>}, {pipeline_mode = #tpu.pipeline_mode<synchronous>, transform_indices = @transform_4, window_bounds = array<i64: 1, 128>}, {transform_indices = @transform_5, window_bounds = array<i64: 16, 128>}]} {
    %c0 = arith.constant 0 : index
    %c0_0 = arith.constant 0 : index
    %0 = vector.load %arg2[%c0, %c0_0] : memref<16x128xf32, #tpu.memory_space<vmem>>, vector<16x128xf32>
    %1 = arith.truncf %0 : vector<16x128xf32> to vector<16x128xbf16>
    %c0_1 = arith.constant 0 : index
    %c0_2 = arith.constant 0 : index
    %2 = vector.load %arg3[%c0_1, %c0_2] : memref<128x128xbf16, #tpu.memory_space<vmem>>, vector<128x128xbf16>
    %cst = arith.constant dense<0.000000e+00> : vector<16x128xf32>
    %3 = tpu.matmul %1, %2, %cst {dimension_numbers = #tpu.dot_dimension_numbers<[1], [0], [0], [1], [0, 0, 1, 1], [], []>} : vector<16x128xbf16>, vector<128x128xbf16>, vector<16x128xf32> -> vector<16x128xf32>
    %c0_3 = arith.constant 0 : index
    %c0_4 = arith.constant 0 : index
    %4 = vector.load %arg4[%c0_3, %c0_4] : memref<1x128xf32, #tpu.memory_space<vmem>>, vector<1x128xf32>
    %5 = vector.broadcast %4 : vector<1x128xf32> to vector<16x128xf32>
    %6 = arith.addf %3, %5 : vector<16x128xf32>
    %cst_5 = arith.constant 0.000000e+00 : f32
    %7 = vector.broadcast %cst_5 : f32 to vector<16x128xf32>
    %8 = arith.maximumf %6, %7 : vector<16x128xf32>
    %9 = arith.truncf %8 : vector<16x128xf32> to vector<16x128xbf16>
    %c0_6 = arith.constant 0 : index
    %c0_7 = arith.constant 0 : index
    %10 = vector.load %arg5[%c0_6, %c0_7] : memref<128x128xbf16, #tpu.memory_space<vmem>>, vector<128x128xbf16>
    %cst_8 = arith.constant dense<0.000000e+00> : vector<16x128xf32>
    %11 = tpu.matmul %9, %10, %cst_8 {dimension_numbers = #tpu.dot_dimension_numbers<[1], [0], [0], [1], [0, 0, 1, 1], [], []>} : vector<16x128xbf16>, vector<128x128xbf16>, vector<16x128xf32> -> vector<16x128xf32>
    %c0_9 = arith.constant 0 : index
    %c0_10 = arith.constant 0 : index
    %12 = vector.load %arg6[%c0_9, %c0_10] : memref<1x128xf32, #tpu.memory_space<vmem>>, vector<1x128xf32>
    %13 = vector.broadcast %12 : vector<1x128xf32> to vector<16x128xf32>
    %14 = arith.addf %11, %13 : vector<16x128xf32>
    %c0_11 = arith.constant 0 : index
    %c0_12 = arith.constant 0 : index
    %15 = vector.load %arg7[%c0_11, %c0_12] : memref<16x128xf32, #tpu.memory_space<vmem>>, vector<16x128xf32>
    tpu.vector_store %arg7[%c0_11, %c0_12], %14 {strides = array<i32>} : memref<16x128xf32, #tpu.memory_space<vmem>>, vector<16x128xf32>,
    return
  }
  func.func @transform_0(%arg0: i32, %arg1: i32) -> (i32, i32) {
    %c0_i32 = arith.constant 0 : i32
    %c0_i32_0 = arith.constant 0 : i32
    return %arg0, %c0_i32 : i32, i32
  }
  func.func @transform_1(%arg0: i32, %arg1: i32) -> (i32, i32) {
    %c0_i32 = arith.constant 0 : i32
    %c0_i32_0 = arith.constant 0 : i32
    return %c0_i32, %arg1 : i32, i32
  }
  func.func @transform_2(%arg0: i32, %arg1: i32) -> (i32, i32) {
    %c0_i32 = arith.constant 0 : i32
    %c0_i32_0 = arith.constant 0 : i32
    return %c0_i32, %arg1 : i32, i32
  }
  func.func @transform_3(%arg0: i32, %arg1: i32) -> (i32, i32) {
    %c0_i32 = arith.constant 0 : i32
    %c0_i32_0 = arith.constant 0 : i32
    return %arg1, %c0_i32 : i32, i32
  }
  func.func @transform_4(%arg0: i32, %arg1: i32) -> (i32, i32) {
    %c0_i32 = arith.constant 0 : i32
    %c0_i32_0 = arith.constant 0 : i32
    %c0_i32_1 = arith.constant 0 : i32
    return %c0_i32, %c0_i32_0 : i32, i32
  }
  func.func @transform_5(%arg0: i32, %arg1: i32) -> (i32, i32) {
    %c0_i32 = arith.constant 0 : i32
    %c0_i32_0 = arith.constant 0 : i32
    return %arg0, %c0_i32 : i32, i32
  }
}

</mosaic_0001>

<bundles_post_ra>
// kernel: tpu_custom_call.1
= control target key start
LH: loop header
LB: loop body
LE: loop exit
PB: predicated region body
PF: predicated region fallthrough
CT: control target
= control target key end

     0   :  { %10 = vsyncpa [#allocation4], 0  ;;  %s514_s0 = inlined_call_operand.hbm [shape: f32[16,128], index: 0, kind: input, shape index: {}]   ;;  %s515_s1 = inlined_call_operand.hbm [shape: bf16[128,128], index: 1, kind: input, shape index: {}]   ;;  %s516_s2 = inlined_call_operand.vmem [shape: f32[1,128], index: 2, kind: input, shape index: {}]   ;;  %s517_s3 = inlined_call_operand.hbm [shape: bf16[128,128], index: 3, kind: input, shape index: {}]   ;;  %s518_s4 = inlined_call_operand.vmem [shape: f32[1,128], index: 4, kind: input, shape index: {}]   ;;  %s519_s5 = inlined_call_operand.hbm [shape: f32[16,128], index: 5, kind: output, shape index: {}]  }
   0x1   :  { %11 = vsyncpa [#allocation7], 0  ;;  %s30_s20 = sshll.u32 %s515_s1, 4  ;;  %s31_s20 = int_to_ptr.hbm [resolvable:$true] %s30_s20 }
   0x2   :  { %12 = vsyncpa [#allocation5], 0  ;;  %s452_s21 = smov [#allocation6]   ;;  %s17_s25 = sshll.u32 %s514_s0, 4  ;;  %s18_s25 = int_to_ptr.hbm [resolvable:$true] %s17_s25 }
   0x3   :  { %s32_s22 = sshll.u32 %s452_s21, 4  ;;  %s453_s26 = smov 64   ;;  %s33_s22 = int_to_ptr.vmem [resolvable:$true] %s32_s22 }
   0x4   :  { %s454_s27 = smov 4   ;;  %s455_s28 = smov [#allocation3]  }
   0x5   :  { %38 = dma.hbm_to_vmem [thread:$0]  %s31_s20, 1024, %s33_s22, [#allocation7], %s453_s26, %s453_s26, %s454_s27  }
   0x6   :  { %s19_s29 = sshll.u32 %s455_s28, 4  ;;  %s456_s30 = smov 128   ;;  %s20_s29 = int_to_ptr.vmem [resolvable:$true] %s19_s29 }
   0x7   :  { %s457_s6 = smov 8   ;;  %s45_s8 = sshll.u32 %s517_s3, 4  ;;  %s46_s8 = int_to_ptr.hbm [resolvable:$true] %s45_s8 }
   0x8   :  { %25 = dma.hbm_to_vmem [thread:$0]  %s18_s25, 256, %s20_s29, [#allocation4], %s456_s30, %s456_s30, %s457_s6  }
   0x9   :  { %s458_s9 = smov [#allocation8]  }
   0xa   :  { %s47_s0 = sshll.u32 %s458_s9, 4  ;;  %s48_s0 = int_to_ptr.vmem [resolvable:$true] %s47_s0 }
   0xb   :  { %53 = dma.hbm_to_vmem [thread:$0]  %s46_s8, 1024, %s48_s0, [#allocation7], %s453_s26, %s453_s26, %s454_s27  }
   0xc   :  { %446 = dma.done.wait [#allocation4], 256  }
   0xd   :  { %447 = vsyncadd [#allocation4], 4294967040 }
   0xe   :  { %448 = dma.done.wait [#allocation7], 2048  }
   0xf   :  { %449 = vsyncadd [#allocation7], 4294965248  ;;  %v331_v0 = vld [vmem:[#allocation6 + $0x38] sm:$0xff]  ;;  %v330_v1 = vld [vmem:[#allocation6 + $0x30] sm:$0xff]  ;;  %s459_s13 = smov [#allocation9]  }
  0x10   :  { %139 = vmatpush.bf16.msra.mxu0 %v331_v0  ;;  %v339_v2 = vld [vmem:[#allocation8 + $0x38] sm:$0xff]  ;;  %v338_v3 = vld [vmem:[#allocation8 + $0x30] sm:$0xff]  ;;  %v329_v4 = vld [vmem:[#allocation6 + $0x28] sm:$0xff]  ;;  %s244_s14 = sshll.u32 %s459_s13, 4  ;;  %s245_s14 = int_to_ptr.vmem [resolvable:$true] %s244_s14 }
  0x11   :  { %224 = vmatpush.bf16.msra.mxu1 %v339_v2  ;;  %v337_v5 = vld [vmem:[#allocation8 + $0x28] sm:$0xff]  ;;  %v328_v6 = vld [vmem:[#allocation6 + $0x20] sm:$0xff]  ;;  %v327_v8 = vld [vmem:[#allocation6 + $0x18] sm:$0xff] }
  0x12   :  { %v336_v7 = vld [vmem:[#allocation8 + $0x20] sm:$0xff]  ;;  %v326_v9 = vld [vmem:[#allocation6 + $0x10] sm:$0xff]  ;;  %v325_v10 = vld [vmem:[#allocation6 + $0x8] sm:$0xff] }
  0x13   :  { %v324_v11 = vld [vmem:[#allocation6] sm:$0xff]  ;;  %v68_v12 = vld [vmem:[#allocation3] sm:$0xff]  ;;  %v69_v13 = vld [vmem:[#allocation3 + $0x8] sm:$0xff] }
  0x14   :  { %140 = vmatpush.bf16.msra.mxu0 %v330_v1  ;;  %v70_v14 = vpack.c.bf16 %v69_v13, %v68_v12  ;;  %v335_v15 = vld [vmem:[#allocation8 + $0x18] sm:$0xff]  ;;  %v334_v16 = vld [vmem:[#allocation8 + $0x10] sm:$0xff]  ;;  %v333_v17 = vld [vmem:[#allocation8 + $0x8] sm:$0xff] }
  0x15   :  { %225 = vmatpush.bf16.msra.mxu1 %v338_v3  ;;  %v332_v18 = vld [vmem:[#allocation8] sm:$0xff]  ;;  %v348_v20 = vld [vmem:[%s516_s2] ss:$0 sm:$0xff]  ;;  %s246_s2 = sshll.u32 %s519_s5, 4  ;;  %s247_s2 = int_to_ptr.hbm [resolvable:$true] %s246_s2 }
  0x16   :  { %v349_v27 = vld [vmem:[%s518_s4] ss:$0 sm:$0xff] }
  0x18   :  { %141 = vmatpush.bf16.msra.mxu0 %v329_v4 }
  0x19   :  { %226 = vmatpush.bf16.msra.mxu1 %v337_v5 }
  0x1c   :  { %142 = vmatpush.bf16.msra.mxu0 %v328_v6 }
  0x1d   :  { %227 = vmatpush.bf16.msra.mxu1 %v336_v7 }
  0x20   :  { %143 = vmatpush.bf16.msra.mxu0 %v327_v8 }
  0x21   :  { %228 = vmatpush.bf16.msra.mxu1 %v335_v15 }
  0x24   :  { %144 = vmatpush.bf16.msra.mxu0 %v326_v9 }
  0x25   :  { %229 = vmatpush.bf16.msra.mxu1 %v334_v16 }
  0x28   :  { %145 = vmatpush.bf16.msra.mxu0 %v325_v10 }
  0x29   :  { %230 = vmatpush.bf16.msra.mxu1 %v333_v17 }
  0x2c   :  { %146 = vmatpush.bf16.msra.mxu0 %v324_v11 }
  0x2d   :  { %231 = vmatpush.bf16.msra.mxu1 %v332_v18 }
  0x2f   :  { %147 = vmatmul.bf16.vlgmr.msra.gmra.mxu0 %v70_v14 }
  0xac   :  { %v148_v19 = vpop.f32.mrf.mxu0 }
  0xad   :  { %v149_v21 = vadd.f32 %v348_v20, %v148_v19 }
  0xaf   :  { %v153_v24 = vmax.f32 %v149_v21, 0.0 }
  0xb4   :  { %v150_v22 = vpop.f32.mrf.mxu0 }
  0xb5   :  { %v151_v23 = vadd.f32 %v348_v20, %v150_v22 }
  0xb7   :  { %v154_v25 = vmax.f32 %v151_v23, 0.0 }
  0xb9   :  { %v155_v26 = vpack.c.bf16 %v154_v25, %v153_v24 }
  0xbb   :  { %232 = vmatmul.bf16.vlgmr.msra.gmra.mxu1 %v155_v26 }
 0x138   :  { %v233_v28 = vpop.f32.mrf.mxu1 }
 0x139   :  { %v234_v29 = vadd.f32 %v349_v27, %v233_v28 }
 0x13b   :  { %238 = vst [vmem:[#allocation9] sm:$0xff] %v234_v29 }
 0x140   :  { %v235_v30 = vpop.f32.mrf.mxu1 }
 0x141   :  { %v236_v31 = vadd.f32 %v349_v27, %v235_v30 }
 0x143   :  { %239 = vst [vmem:[#allocation9 + $0x8] sm:$0xff] %v236_v31 }
 0x144   :  { %252 = dma.vmem_to_hbm [thread:$0]  %s245_s14, 256, %s247_s2, [#allocation5], %s456_s30, %s456_s30, %s457_s6  }
 0x145   :  { %450 = dma.done.wait [#allocation5], 256  }
 0x146   :  { %451 = vsyncadd [#allocation5], 4294967040 }
 0x147   :  { %257 = vsyncpa [#allocation4], 1 }
 0x148   :  { %258 = vsyncpa [#allocation7], 1 }
 0x149   :  { %259 = vsyncpa [#allocation5], 1 }

</bundles_post_ra>
